<compile_context>
chip_gen: v7x
topology: tpu7x:2x2x1
jax: 0.10.0
libtpu: 0.0.40
codegen_flags: <defaults>
</compile_context>

<pallas_src>
import math

import jax
import jax.numpy as jnp
import numpy as np
from jax.experimental import pallas as pl
from jax.experimental.pallas import tpu as pltpu


# ----------------------------- kernels ----------------------------------- #

def _linear_relu_kernel(x_ref, w_ref, b_ref, o_ref):
    """o = relu(x @ W + b) — QVN.forward() for the vector-state case."""
    y = jnp.dot(x_ref[...].astype(jnp.bfloat16), w_ref[...],
                preferred_element_type=jnp.float32)
    o_ref[...] = jnp.maximum(y + b_ref[...], 0.0)


def _qvn_quantiles_kernel(x_ref, taus_ref,
                          wh_ref, bh_ref,
                          pis_ref,
                          wc_ref, bc_ref,
                          w1_ref, b1_ref,
                          w2_ref, b2_ref,
                          o_ref):
    """Fully fused IQN quantile head for one batch tile.

    x_ref    : (TB, S)       f32  raw state tile
    taus_ref : (N, TB)       f32  taus for this tile, (n, b)-major
    wh_ref   : (S, L) bf16,  bh_ref : (1, L) f32         head
    pis_ref  : (1, n_cos)    f32
    wc_ref   : (n_cos, L) bf16, bc_ref : (1, L) f32      cos_embedding
    w1_ref   : (L, L) bf16,  b1_ref : (1, L) f32         ff_1
    w2_ref   : (L, A) bf16,  b2_ref : (1, A) f32         ff_2
    o_ref    : (N, TB, A)    f32
    """
    N, TB = taus_ref.shape
    L = wh_ref.shape[1]
    A = w2_ref.shape[1]
    BN = N * TB

    # state embedding: relu(x @ Wh + bh)  (stays in vregs, never touches HBM)
    emb = jnp.maximum(
        jnp.dot(x_ref[...].astype(jnp.bfloat16), wh_ref[...],
                preferred_element_type=jnp.float32) + bh_ref[...],
        0.0)                                                          # (TB, L) f32

    # cos(tau * pi * i), i = 1..n_cos — f32 on the EUP; rows end up (n, b)-major
    cos = jnp.cos(taus_ref[...][:, :, None] * pis_ref[...][None, :, :])   # (N, TB, n_cos)
    cos = cos.reshape(BN, -1)                                             # (BN, n_cos)

    # cos embedding + relu (bias broadcast per-vreg, no materialized (BN, L) slab)
    cos_x = jnp.maximum(
        jnp.dot(cos.astype(jnp.bfloat16), wc_ref[...],
                preferred_element_type=jnp.float32) + bc_ref[...],
        0.0)                                                          # (BN, L)

    # replicate the state embedding across the N taus: whole-vreg leading-dim broadcast
    emb_rep = jnp.broadcast_to(emb[None, :, :], (N, TB, L)).reshape(BN, L)
    h = emb_rep * cos_x                                               # (BN, L)

    # ff_1 + relu
    h = jnp.maximum(
        jnp.dot(h.astype(jnp.bfloat16), w1_ref[...],
                preferred_element_type=jnp.float32) + b1_ref[...],
        0.0)                                                          # (BN, L)

    # ff_2 (unpadded A; masked store is cheaper than a 32x-inflated padded writeback)
    out = jnp.dot(h.astype(jnp.bfloat16), w2_ref[...],
                  preferred_element_type=jnp.float32) + b2_ref[...]   # (BN, A)
    o_ref[...] = out.reshape(N, TB, A)


# ----------------------------- helpers ------------------------------------ #

def _vmem_capacity_bytes():
    """Physical VMEM of the local TPU generation (fallback: 64 MiB = v7x per-core)."""
    try:
        return int(pltpu.get_tpu_info().vmem_capacity_bytes)
    except Exception:
        return 64 << 20


def _choose_tile_b(B, N, L, n_cos, vmem_cap):
    """Batch-tile size TB derived from the per-generation VMEM budget; keeps >= 2
    grid steps for B >= 16 so the 'parallel' axis can shard across v7x TensorCores."""
    # per (TB*N)-row footprint: double-buffered lane-padded output block
    # + ~5 live f32 (rows, L) intermediates + the cos slab.
    per_row = 2 * 128 * 4 + 5 * L * 4 + n_cos * 4
    max_rows = max(512, int(0.35 * vmem_cap) // per_row)
    tb_cap = max(8, (max_rows // max(N, 1)) // 8 * 8)
    if B % 8 != 0:
        # TODO(synk): ragged batch sizes fall back to a single full tile.
        return B
    if B >= 16:
        tb_cap = min(tb_cap, max(8, (B // 2) // 8 * 8))   # >= 2 grid steps (megacore)
    if B <= tb_cap:
        return B
    best = 8
    for cand in range(8, tb_cap + 1, 8):
        if B % cand == 0:
            best = cand
    return best


def _full_spec(shape):
    # whole array as a single block (used only for the tiny forward() kernel)
    return pl.BlockSpec(shape, lambda *_: (0,) * len(shape))


# ----------------------------- wrappers ----------------------------------- #

def qvn_forward(x, w_head_t, b_head):
    """relu(head(x)) — QVN.forward() for the vector-state case."""
    B, S = x.shape
    L = w_head_t.shape[1]
    return pl.pallas_call(
        _linear_relu_kernel,
        out_shape=jax.ShapeDtypeStruct((B, L), jnp.float32),
        in_specs=[_full_spec((B, S)), _full_spec((S, L)), _full_spec((1, L))],
        out_specs=_full_spec((B, L)),
    )(x, w_head_t, b_head.reshape(1, L))


def qvn_get_quantiles(x, taus, params):
    """QVN.get_quantiles(input, taus) — returns (B, N, A). Single fused kernel."""
    B, S = x.shape
    _, N = taus.shape
    L = params["w_head_t"].shape[1]
    A = params["w2_t"].shape[1]
    n_cos = params["pis"].shape[1]

    cap = _vmem_capacity_bytes()
    TB = _choose_tile_b(B, N, L, n_cos, cap)
    num_tiles = B // TB

    # (n, b)-major taus, pre-split by batch tile: (num_tiles, N, TB).
    # Avoids the lane-padded (B*N, 1) block and makes the in-kernel embedding
    # replication a whole-vreg broadcast.
    taus_tiled = jnp.transpose(taus.T.reshape(N, num_tiles, TB), (1, 0, 2))

    const = lambda i: (0, 0)    # weights / biases stay VMEM-resident

    out_nba = pl.pallas_call(
        _qvn_quantiles_kernel,
        out_shape=jax.ShapeDtypeStruct((N, B, A), jnp.float32),
        grid=(num_tiles,),
        in_specs=[
            pl.BlockSpec((TB, S), lambda i: (i, 0)),              # x (batch tile)
            pl.BlockSpec((None, N, TB), lambda i: (i, 0, 0)),     # taus (tile, (n,b)-major)
            # TODO(synk): these constant-index weight/bias specs could use
            # pipeline_mode=pl.Buffered(1) to drop the second VMEM buffer.
            pl.BlockSpec((S, L), const), pl.BlockSpec((1, L), const),       # head
            pl.BlockSpec((1, n_cos), const),                                # pis
            pl.BlockSpec((n_cos, L), const), pl.BlockSpec((1, L), const),   # cos_embedding
            pl.BlockSpec((L, L), const), pl.BlockSpec((1, L), const),       # ff_1
            pl.BlockSpec((L, A), const), pl.BlockSpec((1, A), const),       # ff_2
        ],
        out_specs=pl.BlockSpec((N, TB, A), lambda i: (0, i, 0)),
        compiler_params=pltpu.CompilerParams(
            dimension_semantics=("parallel",),
            vmem_limit_bytes=max(32 << 20, min(3 * cap // 4, 112 << 20))),
    )(x, taus_tiled,
      params["w_head_t"], params["b_head"].reshape(1, L),
      params["pis"],
      params["wc_t"], params["bc"].reshape(1, L),
      params["w1_t"], params["b1"].reshape(1, L),
      params["w2_t"], params["b2"].reshape(1, A))

    # un-permute the (n, b)-major kernel output back to (B, N, A)
    return jnp.transpose(out_nba, (1, 0, 2))


# ----------------------------- parameter init ----------------------------- #

def init_params(key, state_size, action_size, layer_size, n_cos=64):
    """Deterministic synthetic init (Kaiming-normal-style for relu layers).
    Weights are stored bf16 (MXU-native); biases / pis stay f32."""
    S, L, A = state_size, layer_size, action_size
    ks = jax.random.split(key, 8)

    def kaiming(k, fan_in, shape):
        return jax.random.normal(k, shape, jnp.float32) * math.sqrt(2.0 / fan_in)

    wdt = jnp.bfloat16
    return {
        # weights stored pre-transposed: (in_features, out_features)
        "w_head_t": kaiming(ks[0], S, (S, L)).astype(wdt),
        "b_head":   jax.random.normal(ks[1], (L,), jnp.float32) * 0.01,
        "wc_t":     kaiming(ks[2], n_cos, (n_cos, L)).astype(wdt),
        "bc":       jax.random.normal(ks[3], (L,), jnp.float32) * 0.01,
        "w1_t":     kaiming(ks[4], L, (L, L)).astype(wdt),
        "b1":       jax.random.normal(ks[5], (L,), jnp.float32) * 0.01,
        "w2_t":     kaiming(ks[6], L, (L, A)).astype(wdt),
        "b2":       jax.random.normal(ks[7], (A,), jnp.float32) * 0.01,
        # pis = pi * i, i = 1..n_cos  (matches the PyTorch self.pis buffer)
        "pis":      (jnp.pi * jnp.arange(1, n_cos + 1, dtype=jnp.float32)).reshape(1, n_cos),
    }


# ----------------------------- reference (pure JAX) ----------------------- #

def reference_get_quantiles(x, taus, p):
    B, N = taus.shape
    L = p["w_head_t"].shape[1]
    A = p["w2_t"].shape[1]
    wh = p["w_head_t"].astype(jnp.float32)
    wc = p["wc_t"].astype(jnp.float32)
    w1 = p["w1_t"].astype(jnp.float32)
    w2 = p["w2_t"].astype(jnp.float32)
    emb = jnp.maximum(x @ wh + p["b_head"], 0.0)                      # (B, L)
    cos = jnp.cos(taus[:, :, None] * p["pis"].reshape(1, 1, -1))      # (B, N, n_cos)
    cos = cos.reshape(B * N, -1)
    cos_x = jnp.maximum(cos @ wc + p["bc"], 0.0).reshape(B, N, L)
    h = (emb[:, None, :] * cos_x).reshape(B * N, L)
    h = jnp.maximum(h @ w1 + p["b1"], 0.0)
    out = h @ w2 + p["b2"]
    return out.reshape(B, N, A)


# ----------------------------- main --------------------------------------- #

if __name__ == "__main__":
    # Vector-state QVN: state_size=(32,), layer_size=128 (multiple of 128 for lane/MXU
    # utilisation), action_size=4, N taus=8.
    B, S, L, A, N = 2, 32, 128, 4, 8

    key = jax.random.PRNGKey(0)
    k_param, k_x, k_tau = jax.random.split(key, 3)

    params = init_params(k_param, state_size=S, action_size=A, layer_size=L)
    x = jax.random.normal(k_x, (B, S), jnp.float32)
    taus = jax.random.uniform(k_tau, (B, N), jnp.float32)

    # forward() — state embedding
    emb = qvn_forward(x, params["w_head_t"], params["b_head"])
    jax.block_until_ready(emb)

    # get_quantiles() — single fused Pallas kernel
    q = qvn_get_quantiles(x, taus, params)
    jax.block_until_ready(q)

    # verify against a pure-JAX reference (bf16 weights => loose tolerance)
    emb_ref = jnp.maximum(x @ params["w_head_t"].astype(jnp.float32) + params["b_head"], 0.0)
    q_ref = reference_get_quantiles(x, taus, params)
    np.testing.assert_allclose(np.asarray(emb), np.asarray(emb_ref), atol=5e-2, rtol=5e-2)
    np.testing.assert_allclose(np.asarray(q), np.asarray(q_ref), atol=5e-2, rtol=5e-2)
    assert q.shape == (B, N, A)

    print("KERNEL_OK")
</pallas_src>

<mosaic_0001>
module attributes {stable_mosaic.version = 11 : i64} {
  func.func @_linear_relu_kernel(%arg0: memref<2x32xf32, #tpu.memory_space<vmem>>, %arg1: memref<32x128xbf16, #tpu.memory_space<vmem>>, %arg2: memref<1x128xf32, #tpu.memory_space<vmem>>, %arg3: memref<2x128xf32, #tpu.memory_space<vmem>>) attributes {dimension_semantics = [], scalar_prefetch = 0 : i64, scratch_operands = 0 : i64, tpu.core_type = #tpu.core_type<tc>} {
    %c0 = arith.constant 0 : index
    %c0_0 = arith.constant 0 : index
    %0 = vector.load %arg0[%c0, %c0_0] : memref<2x32xf32, #tpu.memory_space<vmem>>, vector<2x32xf32>
    %1 = arith.truncf %0 : vector<2x32xf32> to vector<2x32xbf16>
    %c0_1 = arith.constant 0 : index
    %c0_2 = arith.constant 0 : index
    %2 = vector.load %arg1[%c0_1, %c0_2] : memref<32x128xbf16, #tpu.memory_space<vmem>>, vector<32x128xbf16>
    %cst = arith.constant dense<0.000000e+00> : vector<2x128xf32>
    %3 = tpu.matmul %1, %2, %cst {dimension_numbers = #tpu.dot_dimension_numbers<[1], [0], [0], [1], [0, 0, 1, 1], [], []>} : vector<2x32xbf16>, vector<32x128xbf16>, vector<2x128xf32> -> vector<2x128xf32>
    %c0_3 = arith.constant 0 : index
    %c0_4 = arith.constant 0 : index
    %4 = vector.load %arg2[%c0_3, %c0_4] : memref<1x128xf32, #tpu.memory_space<vmem>>, vector<1x128xf32>
    %5 = vector.broadcast %4 : vector<1x128xf32> to vector<2x128xf32>
    %6 = arith.addf %3, %5 : vector<2x128xf32>
    %cst_5 = arith.constant 0.000000e+00 : f32
    %7 = vector.broadcast %cst_5 : f32 to vector<2x128xf32>
    %8 = arith.maximumf %6, %7 : vector<2x128xf32>
    %c0_6 = arith.constant 0 : index
    %c0_7 = arith.constant 0 : index
    %9 = vector.load %arg3[%c0_6, %c0_7] : memref<2x128xf32, #tpu.memory_space<vmem>>, vector<2x128xf32>
    tpu.vector_store %arg3[%c0_6, %c0_7], %8 {strides = array<i32>} : memref<2x128xf32, #tpu.memory_space<vmem>>, vector<2x128xf32>,
    return
  }
}

</mosaic_0001>

<bundles_post_ra>
// kernel: tpu_custom_call.1
= control target key start
LH: loop header
LB: loop body
LE: loop exit
PB: predicated region body
PF: predicated region fallthrough
CT: control target
= control target key end

     0   :  { %8 = vsyncpa [#allocation3], 0  ;;  %s298_s0 = inlined_call_operand.hbm [shape: f32[2,32], index: 0, kind: input, shape index: {}]   ;;  %s299_s1 = inlined_call_operand.hbm [shape: bf16[32,128], index: 1, kind: input, shape index: {}]   ;;  %s300_s2 = inlined_call_operand.vmem [shape: f32[1,128], index: 2, kind: input, shape index: {}]   ;;  %s301_s3 = inlined_call_operand.hbm [shape: f32[2,128], index: 3, kind: output, shape index: {}]  }
   0x1   :  { %9 = vsyncpa [#allocation6], 0 }
   0x2   :  { %10 = vsyncpa [#allocation4], 0  ;;  %s225_s12 = smov [#allocation2]   ;;  %s226_s14 = smov [#allocation5]  }
   0x3   :  { %s17_s13 = sshll.u32 %s225_s12, 4  ;;  %s26_s15 = sshll.u32 %s226_s14, 4  ;;  %s18_s13 = int_to_ptr.vmem [resolvable:$true] %s17_s13  ;;  %s252_s15 = int_to_ptr.vmem [resolvable:$true] %s26_s15 }
   0x4   :  { %s153_s18 = scalar_lea.hbm %s298_s0, 32 }
   0x5   :  { %p154_p0 = scmp.ne.s32.totalorder %s298_s0, %s153_s18  ;;  %p157_p1 = scmp.lt.u32.totalorder %s153_s18, %s298_s0 }
   0x7   :  { %p159_p2 = pnand %p157_p1, %p154_p0 }
   0x9   :  { %162 = shalt.err (!%p159_p2)
}
   0xa   :  { %s163_s23 = scalar_lea.vmem %s18_s13, 32  ;;  %p168_p4 = scmp.lt.s32.totalorder %s18_s13, %s18_s13 }
   0xb   :  { %p164_p3 = scmp.ne.s32.totalorder %s18_s13, %s163_s23  ;;  %p169_p5 = scmp.lt.s32.totalorder %s163_s23, %s163_s23 }
   0xd   :  { %p170_p6 = por %p169_p5, %p168_p4 }
   0xf   :  { %p171_p7 = pnand %p170_p6, %p164_p3 }
  0x11   :  { %174 = shalt.err (!%p171_p7)
}
  0x12   :  { %20 = dma.hbm_to_vmem [thread:$0]  %s298_s0, 32, %s18_s13, [#allocation3]  }
  0x13   :  { %s175_s28 = scalar_lea.hbm %s299_s1, 256 }
  0x14   :  { %p176_p8 = scmp.ne.s32.totalorder %s299_s1, %s175_s28  ;;  %p179_p9 = scmp.lt.u32.totalorder %s175_s28, %s299_s1 }
  0x16   :  { %p181_p10 = pnand %p179_p9, %p176_p8 }
  0x18   :  { %184 = shalt.err (!%p181_p10)
}
  0x19   :  { %s185_s6 = scalar_lea.vmem %s252_s15, 256  ;;  %p190_p12 = scmp.lt.s32.totalorder %s252_s15, %s252_s15 }
  0x1a   :  { %p186_p11 = scmp.ne.s32.totalorder %s252_s15, %s185_s6  ;;  %p191_p13 = scmp.lt.s32.totalorder %s185_s6, %s185_s6 }
  0x1c   :  { %p192_p0 = por %p191_p13, %p190_p12 }
  0x1e   :  { %p193_p1 = pnand %p192_p0, %p186_p11 }
  0x20   :  { %196 = shalt.err (!%p193_p1)
}
  0x21   :  { %s227_s0 = smov 64   ;;  %s228_s7 = smov 4  }
  0x22   :  { %32 = dma.hbm_to_vmem [thread:$0]  %s299_s1, 256, %s252_s15, [#allocation6], %s227_s0, %s227_s0, %s228_s7  }
  0x23   :  { %219 = dma.done.wait [#allocation3], 32  }
  0x24   :  { %220 = vsyncadd [#allocation3], 4294967264 }
  0x25   :  { %221 = dma.done.wait [#allocation6], 256  }
  0x26   :  { %222 = vsyncadd [#allocation6], 4294967040  ;;  %v229_v0 = vmov 0.0   ;;  %vm230_vm0 = vmmov 0   ;;  %v151_v1 = vld [vmem:[#allocation5] sm:$0xff]   ;;  %v152_v2 = vld [vmem:[#allocation5 + $0x8] sm:$0xff]  }
  0x27   :  { %136 = vmatprep.subr.bf16.mxu0 %v229_v0  ;;  %140 = vmatprep.mubr.msk.bf16.mxu0 %vm230_vm0, %v229_v0  ;;  %v42_v3 = vld [vmem:[#allocation2] sm:$0x3]  ;;  %vm67_vm1 = vcmask 261120   ;;  %s231_s1 = smov [#allocation7]  }
  0x28   :  { %137 = vmatpush3.bf16.msra.mxu0 %v151_v1  ;;  %v43_v4 = vpack.c.bf16 %v42_v3, %v42_v3  ;;  %v129_v5 = vld [vmem:[%s300_s2] ss:$0 sm:$0xff]  ;;  %s119_s12 = sshll.u32 %s231_s1, 4  ;;  %s120_s12 = int_to_ptr.vmem [resolvable:$true] %s119_s12 }
  0x29   :  { %138 = vmatprep.subr.bf16.mxu0 %v229_v0  ;;  %s197_s13 = scalar_lea.vmem %s120_s12, 32  ;;  %p202_p3 = scmp.lt.s32.totalorder %s120_s12, %s120_s12 }
  0x2a   :  { %p198_p2 = scmp.ne.s32.totalorder %s120_s12, %s197_s13  ;;  %p203_p4 = scmp.lt.s32.totalorder %s197_s13, %s197_s13 }
  0x2c   :  { %139 = vmatpush3.bf16.msra.mxu0 %v152_v2  ;;  %p204_p5 = por %p203_p4, %p202_p3 }
  0x2e   :  { %p205_p6 = pnand %p204_p5, %p198_p2 }
  0x2f   :  { %141 = vmatmul.mubr.msk.bf16.vlgmr.msra.gmra.mrb[0].mxu0 %vm67_vm1, %v43_v4 }
 0x102   :  { %v105_v6 = vpop.f32.mrb[0].mxu0 }
 0x103   :  { %v106_v7 = vadd.f32 %v129_v5, %v105_v6  ;;  %v142_v8 = vpop.f32.mrb[1].mxu0 }
 0x104   :  { %v108_v9 = vpop.f32.mrb[2].mxu0 }
 0x105   :  { %v111_v10 = vmax.f32 %v106_v7, 0.0  ;;  %v143_v11 = vpop.f32.mrb[3].mxu0 }
 0x107   :  { %112 = vst [vmem:[#allocation7] sm:$0x3] %v111_v10 }
 0x108   :  { %208 = shalt.err (!%p205_p6)
}
 0x109   :  { %s209_s2 = scalar_lea.hbm %s301_s3, 32 }
 0x10a   :  { %p210_p7 = scmp.ne.s32.totalorder %s301_s3, %s209_s2  ;;  %p213_p8 = scmp.lt.u32.totalorder %s209_s2, %s301_s3 }
 0x10c   :  { %p215_p9 = pnand %p213_p8, %p210_p7 }
 0x10e   :  { %218 = shalt.err (!%p215_p9)
}
 0x10f   :  { %122 = dma.vmem_to_hbm [thread:$0]  %s120_s12, 32, %s301_s3, [#allocation4]  }
 0x110   :  { %223 = dma.done.wait [#allocation4], 32  }
 0x111   :  { %224 = vsyncadd [#allocation4], 4294967264 }
 0x112   :  { %126 = vsyncpa [#allocation3], 1 }
 0x113   :  { %127 = vsyncpa [#allocation6], 1 }
 0x114   :  { %128 = vsyncpa [#allocation4], 1 }

</bundles_post_ra>
